<compile_context>
chip_gen: v6e
topology: v6e:2x2x1
jax: 0.10.0
libtpu: 0.0.40
codegen_flags: <defaults>
</compile_context>

<pallas_src>
import functools

import jax
import jax.numpy as jnp
from jax import lax
from jax.experimental import pallas as pl
from jax.experimental.pallas import tpu as pltpu


# --------------------------------------------------------------------------- #
# helpers
# --------------------------------------------------------------------------- #
def _round_up(x, m):
    return (x + m - 1) // m * m


def _sublane_tile(dtype):
    # f32 -> 8, bf16/f16 -> 16, int8/fp8 -> 32
    return max(8, 32 // jnp.dtype(dtype).itemsize)


def _pick_panel_width(n_pad, target=512):
    """Largest of {512,384,256,128} dividing n_pad while keeping >=2 panels."""
    for cand in (512, 384, 256, 128):
        if cand <= target and cand < n_pad and n_pad % cand == 0:
            return cand
    return n_pad  # single 128-wide panel graph


def _vmem_capacity_bytes():
    """Per-TensorCore VMEM capacity, with a per-generation fallback."""
    try:
        info = pltpu.get_tpu_info()
        for name in ("vmem_capacity_bytes", "vmem_size_bytes"):
            cap = getattr(info, name, None)
            if cap:
                return int(cap)
    except Exception:
        pass
    kind = ""
    try:
        kind = jax.devices()[0].device_kind.lower()
    except Exception:
        pass
    if "v7" in kind:
        return 64 << 20          # v7x: 64 MiB / TC
    return 128 << 20             # v4 / v5e / v5p / v6e: 128 MiB / TC


def prepare_interact_mat(interact_mat, *, compute_dtype=jnp.bfloat16,
                         panel_width=None):
    """Pad, transpose, cast and split A into column panels of A^T.

    Returns A^T as [n_panels, n_pad, panel_width] in `compute_dtype`.  This is
    step-invariant: cache it across training steps and pass it in place of the
    dense interact_mat to keep the O(N^2) pad/cast/transpose off the hot path.
    """
    n_total = interact_mat.shape[0]
    assert interact_mat.shape == (n_total, n_total)
    n_pad = _round_up(n_total, 128)
    tn = panel_width or _pick_panel_width(n_pad)
    assert n_pad % tn == 0 and tn % 128 == 0
    pad = n_pad - n_total
    # (A @ E)^T == E^T @ A^T, so the kernels consume A^T (no symmetry assumed).
    a_t = jnp.pad(interact_mat.T.astype(compute_dtype), ((0, pad), (0, pad)))
    # [n_pad, n_pad] -> [n_panels, n_pad, tn]: contiguous column panels in HBM
    # => efficient (non-strided) DMA and canonical leading-axis slicing.
    return a_t.reshape(n_pad, n_pad // tn, tn).transpose(1, 0, 2)


# --------------------------------------------------------------------------- #
# RESIDENT kernel: A^T lands in VMEM once; its load is overlapped with hop 1.
# --------------------------------------------------------------------------- #
def _graphconv_resident_kernel(e0_t_ref, a_hbm_ref, mean_t_ref, layer_t_ref,
                               a_vmem_ref, ego_ref, sem_ref,
                               *, n_hops, tn, n_panels, compute_dtype):
    """All refs transposed: embeddings are E^T [Dp, Np] (lane-dense outputs).

    e0_t_ref   : [Dp, Np] f32 hop-0 embeddings (VMEM)
    a_hbm_ref  : [n_panels, Np, tn] A^T column panels (HBM, compute dtype)
    mean_t_ref : [Dp, Np] f32 mean over hops 1..n_hops
    layer_t_ref: [Dp, Np] f32 embeddings after hop 1
    a_vmem_ref : [n_panels, Np, tn] VMEM scratch for A^T
    ego_ref    : [Dp, Np] f32 scratch carrying E_k between hops
    sem_ref    : (n_panels,) DMA semaphores
    """
    lookahead = min(2, n_panels)

    def a_copy(j):  # j is a static Python int
        return pltpu.make_async_copy(a_hbm_ref.at[j], a_vmem_ref.at[j],
                                     sem_ref.at[j])

    for j in range(lookahead):
        a_copy(j).start()

    lhs0 = e0_t_ref[...].astype(compute_dtype)

    # ---- hop 1: compute each column panel as soon as its DMA lands, hiding
    # the HBM->VMEM load of A^T behind the hop-1 matmuls. ----
    for j in range(n_panels):
        a_copy(j).wait()
        if j + lookahead < n_panels:
            a_copy(j + lookahead).start()
        col = j * tn
        layer_t_ref[:, col:col + tn] = jnp.dot(
            lhs0, a_vmem_ref[j], preferred_element_type=jnp.float32)

    ego1 = layer_t_ref[...]
    mean_t_ref[...] = ego1          # running sum over hops
    ego_ref[...] = ego1

    # ---- hops 2..n_hops: A^T is now fully VMEM-resident. ----
    for _ in range(1, n_hops):      # small static trip count
        lhs = ego_ref[...].astype(compute_dtype)
        for j in range(n_panels):
            col = j * tn
            ego_ref[:, col:col + tn] = jnp.dot(
                lhs, a_vmem_ref[j], preferred_element_type=jnp.float32)
        mean_t_ref[...] = mean_t_ref[...] + ego_ref[...]

    mean_t_ref[...] = mean_t_ref[...] * jnp.float32(1.0 / n_hops)


# --------------------------------------------------------------------------- #
# TILED / STREAMED kernel: grid = (d_block, hop, panel); A^T panels streamed,
# E_k / accumulator / hop-1 result carried in VMEM scratch across grid steps.
# --------------------------------------------------------------------------- #
def _graphconv_tiled_kernel(e0_t_ref, a_t_ref, mean_t_ref, layer_t_ref,
                            e_a_ref, e_b_ref, acc_ref, layer_sc_ref,
                            *, n_hops, tn, n_panels, compute_dtype):
    """e0_t_ref: [td, Np] f32; a_t_ref: [Np, tn] A^T column panel (compute dtype);
    mean/layer out blocks: [td, tn] f32; scratch: [n_panels, td, tn] f32 each."""
    h = pl.program_id(1)
    j = pl.program_id(2)

    # Once per D block (start of hop 0): load E_0 panels into the ping buffer.
    @pl.when(jnp.logical_and(h == 0, j == 0))
    def _init():
        for p in range(n_panels):
            e_a_ref[p] = e0_t_ref[:, p * tn:(p + 1) * tn]

    def step(src_ref, dst_ref):
        td = src_ref.shape[1]

        def contract(p, acc):
            off = pl.multiple_of(p * tn, 128)
            lhs = src_ref[p].astype(compute_dtype)          # [td, tn]
            rhs = a_t_ref[pl.ds(off, tn), :]                # [tn, tn]
            return acc + jnp.dot(lhs, rhs, preferred_element_type=jnp.float32)

        panel = lax.fori_loop(0, n_panels, contract,
                              jnp.zeros((td, tn), jnp.float32),
                              unroll=n_panels <= 8)
        dst_ref[j] = panel

        @pl.when(h == 0)
        def _():
            acc_ref[j] = panel
            layer_sc_ref[j] = panel

        @pl.when(h > 0)
        def _():
            acc_ref[j] = acc_ref[j] + panel

        # Output blocks are (re)written on every visit; only the final hop's
        # write-back survives in HBM, so intermediate values are harmless.
        layer_t_ref[...] = layer_sc_ref[j]
        is_last = h == n_hops - 1
        mean_t_ref[...] = jnp.where(is_last,
                                    acc_ref[j] * jnp.float32(1.0 / n_hops),
                                    acc_ref[j])

    @pl.when(lax.rem(h, 2) == 0)
    def _even():
        step(e_a_ref, e_b_ref)

    @pl.when(lax.rem(h, 2) == 1)
    def _odd():
        step(e_b_ref, e_a_ref)


# --------------------------------------------------------------------------- #
# wrapper
# --------------------------------------------------------------------------- #
def graph_conv_forward(user_embed, item_embed, interact_mat, n_hops, *,
                       compute_dtype=jnp.bfloat16, path="auto",
                       panel_width=None, num_d_blocks=1):
    """Pallas implementation of GraphConv.forward (perturbed=False path).

    `interact_mat` may be the dense [N, N] matrix or the cached output of
    prepare_interact_mat().  Returns (user_all, item_all, user_layer,
    item_layer), matching the torch module's return tuple.
    """
    assert n_hops >= 1
    n_users, d = user_embed.shape
    n_items, d2 = item_embed.shape
    assert d2 == d
    n_total = n_users + n_items
    out_dtype = user_embed.dtype

    n_pad = _round_up(n_total, 128)                 # lane axis
    sub = _sublane_tile(compute_dtype)
    d_pad = _round_up(d, sub)                       # sublane axis (dtype-aware)

    # ---- hoisted, cacheable operand preparation -------------------------- #
    if interact_mat.ndim == 3:                      # pre-prepared A^T panels
        a_t_p = interact_mat
        n_panels, n_pad_a, tn = a_t_p.shape
        assert n_pad_a == n_pad and n_panels * tn == n_pad
        assert a_t_p.dtype == jnp.dtype(compute_dtype)
        if panel_width is not None:
            assert panel_width == tn
    else:
        assert interact_mat.shape == (n_total, n_total)
        tn = panel_width or _pick_panel_width(n_pad)
        a_t_p = prepare_interact_mat(interact_mat, compute_dtype=compute_dtype,
                                     panel_width=tn)
        n_panels = n_pad // tn

    ego0 = jnp.concatenate([user_embed, item_embed], axis=0).astype(jnp.float32)
    e0_t = jnp.pad(ego0.T, ((0, d_pad - d), (0, n_pad - n_total)))  # [Dp, Np] f32

    itemsize_c = jnp.dtype(compute_dtype).itemsize
    emb_f32 = d_pad * n_pad * 4
    vmem_cap = _vmem_capacity_bytes()
    budget = int(0.9 * vmem_cap)

    resident_need = (n_pad * n_pad * itemsize_c      # resident A^T scratch
                     + 6 * emb_f32                   # e0, outputs, ego, temps
                     + (4 << 20))                    # margin / internal scratch
    if path == "resident":
        use_resident = True
    elif path == "tiled":
        use_resident = False
    else:  # auto: fall back to streaming instead of an under-budget limit
        use_resident = resident_need <= budget

    flops = 2 * d_pad * n_pad * n_pad * n_hops

    if use_resident:
        vmem_limit = min(max(resident_need, 32 << 20), int(0.92 * vmem_cap))
        cost = pl.CostEstimate(flops=int(flops), transcendentals=0,
                               bytes_accessed=int(n_pad * n_pad * itemsize_c
                                                  + 3 * emb_f32))
        kernel = functools.partial(_graphconv_resident_kernel, n_hops=n_hops,
                                   tn=tn, n_panels=n_panels,
                                   compute_dtype=compute_dtype)
        mean_t, layer_t = pl.pallas_call(
            kernel,
            out_shape=(jax.ShapeDtypeStruct((d_pad, n_pad), jnp.float32),
                       jax.ShapeDtypeStruct((d_pad, n_pad), jnp.float32)),
            in_specs=[
                pl.BlockSpec(memory_space=pltpu.MemorySpace.VMEM),  # E_0^T
                pl.BlockSpec(memory_space=pl.ANY),                  # A^T (HBM)
            ],
            out_specs=(
                pl.BlockSpec(memory_space=pltpu.MemorySpace.VMEM),
                pl.BlockSpec(memory_space=pltpu.MemorySpace.VMEM),
            ),
            scratch_shapes=[
                pltpu.VMEM((n_panels, n_pad, tn), compute_dtype),   # A^T
                pltpu.VMEM((d_pad, n_pad), jnp.float32),            # E_k carry
                pltpu.SemaphoreType.DMA((n_panels,)),
            ],
            compiler_params=pltpu.CompilerParams(vmem_limit_bytes=vmem_limit),
            cost_estimate=cost,
        )(e0_t, a_t_p)
    else:
        # D split ("parallel" leading axis) lets v7x's second TensorCore take
        # half the rows of E^T; rows are independent so no cross-core exchange.
        if num_d_blocks < 1:
            num_d_blocks = 1
        if d_pad % num_d_blocks != 0 or (d_pad // num_d_blocks) % sub != 0:
            num_d_blocks = 1
        td = d_pad // num_d_blocks

        tiled_need = (2 * n_pad * tn * itemsize_c        # A panel, double buffered
                      + 2 * td * n_pad * 4               # e0 block
                      + 4 * td * n_pad * 4               # carried scratch
                      + 8 * td * tn * 4                  # output blocks
                      + (4 << 20))
        vmem_limit = min(max(tiled_need, 32 << 20), int(0.92 * vmem_cap))
        cost = pl.CostEstimate(
            flops=int(flops), transcendentals=0,
            bytes_accessed=int(n_hops * num_d_blocks * n_pad * n_pad * itemsize_c
                               + (2 * n_hops + 1) * emb_f32))
        kernel = functools.partial(_graphconv_tiled_kernel, n_hops=n_hops,
                                   tn=tn, n_panels=n_panels,
                                   compute_dtype=compute_dtype)
        mean_t, layer_t = pl.pallas_call(
            kernel,
            out_shape=(jax.ShapeDtypeStruct((d_pad, n_pad), jnp.float32),
                       jax.ShapeDtypeStruct((d_pad, n_pad), jnp.float32)),
            grid_spec=pltpu.PrefetchScalarGridSpec(
                num_scalar_prefetch=0,
                grid=(num_d_blocks, n_hops, n_panels),
                in_specs=[
                    pl.BlockSpec((td, n_pad), lambda di, h, j: (di, 0)),
                    pl.BlockSpec((None, n_pad, tn), lambda di, h, j: (j, 0, 0)),
                ],
                out_specs=(
                    pl.BlockSpec((td, tn), lambda di, h, j: (di, j)),
                    pl.BlockSpec((td, tn), lambda di, h, j: (di, j)),
                ),
                scratch_shapes=[pltpu.VMEM((n_panels, td, tn), jnp.float32)
                                for _ in range(4)],
            ),
            compiler_params=pltpu.CompilerParams(
                dimension_semantics=("parallel", "arbitrary", "arbitrary"),
                vmem_limit_bytes=vmem_limit),
            cost_estimate=cost,
        )(e0_t, a_t_p)

    # Un-pad and transpose back to [N, D] once, in the wrapper.
    mean_emb = mean_t[:d, :n_total].T.astype(out_dtype)
    layer_emb = layer_t[:d, :n_total].T.astype(out_dtype)
    return (mean_emb[:n_users], mean_emb[n_users:],
            layer_emb[:n_users], layer_emb[n_users:])


# --------------------------------------------------------------------------- #
# reference + test harness
# --------------------------------------------------------------------------- #
def _reference_forward(user_embed, item_embed, interact_mat, n_hops):
    """Pure-JAX reference mirroring the torch forward (perturbed=False)."""
    ego = jnp.concatenate([user_embed, item_embed], axis=0)
    outs = []
    for _ in range(n_hops):
        ego = interact_mat @ ego
        outs.append(ego)
    mean = jnp.mean(jnp.stack(outs, axis=1), axis=1)
    layer = outs[0]
    n_users = user_embed.shape[0]
    return mean[:n_users], mean[n_users:], layer[:n_users], layer[n_users:]


def _make_case(key, n_users, n_items, d, density=0.1):
    k_u, k_i, k_a = jax.random.split(key, 3)
    user = jax.random.normal(k_u, (n_users, d), dtype=jnp.float32) * 0.1
    item = jax.random.normal(k_i, (n_items, d), dtype=jnp.float32) * 0.1
    n_total = n_users + n_items
    adj_ui = (jax.random.uniform(k_a, (n_users, n_items)) < density
              ).astype(jnp.float32)
    adj = jnp.zeros((n_total, n_total), jnp.float32)
    adj = adj.at[:n_users, n_users:].set(adj_ui)
    adj = adj.at[n_users:, :n_users].set(adj_ui.T)
    deg = jnp.clip(adj.sum(axis=1), 1.0, None)
    dinv = 1.0 / jnp.sqrt(deg)
    return user, item, adj * dinv[:, None] * dinv[None, :]


def _check(outs, refs, atol, rtol, label):
    for o, r in zip(outs, refs):
        assert o.shape == r.shape and o.dtype == r.dtype, label
        err = float(jnp.max(jnp.abs(o - r)))
        assert jnp.allclose(o, r, atol=atol, rtol=rtol), (label, err)


if __name__ == "__main__":
    key = jax.random.PRNGKey(0)
    k1, k2 = jax.random.split(key)

    # Case 1: small graph (n_total=112 exercises lane padding), n_hops=3.
    u1, i1, m1 = _make_case(k1, 40, 72, 32, density=0.1)
    refs1 = _reference_forward(u1, i1, m1, 3)

    outs = graph_conv_forward(u1, i1, m1, 3, compute_dtype=jnp.float32,
                              path="resident")
    jax.block_until_ready(outs)
    _check(outs, refs1, 1e-5, 1e-5, "resident/f32")

    outs = graph_conv_forward(u1, i1, m1, 3, compute_dtype=jnp.float32,
                              path="tiled")
    jax.block_until_ready(outs)
    _check(outs, refs1, 1e-5, 1e-5, "tiled/f32")

    outs = graph_conv_forward(u1, i1, m1, 3)           # auto path, bf16 A^T
    jax.block_until_ready(outs)
    _check(outs, refs1, 5e-3, 5e-2, "auto/bf16")

    # Case 2: larger padded graph (n_total=512): multi-panel streamed path with
    # D split into two blocks (v7x 2nd-TensorCore layout) and a cached A^T.
    u2, i2, m2 = _make_case(k2, 200, 312, 64, density=0.05)
    refs2 = _reference_forward(u2, i2, m2, 2)
    a_prep = prepare_interact_mat(m2, compute_dtype=jnp.bfloat16,
                                  panel_width=128)

    outs = graph_conv_forward(u2, i2, a_prep, 2, path="tiled",
                              panel_width=128, num_d_blocks=2)
    jax.block_until_ready(outs)
    _check(outs, refs2, 5e-3, 5e-2, "tiled/bf16/512")

    outs = graph_conv_forward(u2, i2, a_prep, 2)       # auto -> resident
    jax.block_until_ready(outs)
    _check(outs, refs2, 5e-3, 5e-2, "resident/bf16/512")

    print("KERNEL_OK")
</pallas_src>

<mosaic_0001>
module attributes {stable_mosaic.version = 11 : i64} {
  func.func @_graphconv_resident_kernel(%arg0: memref<32x128xf32, #tpu.memory_space<vmem>>, %arg1: memref<1x128x128xf32, #tpu.memory_space<any>>, %arg2: memref<32x128xf32, #tpu.memory_space<vmem>>, %arg3: memref<32x128xf32, #tpu.memory_space<vmem>>, %arg4: memref<1x128x128xf32, #tpu.memory_space<vmem>>, %arg5: memref<32x128xf32, #tpu.memory_space<vmem>>, %arg6: memref<1x!tpu.dma_semaphore, #tpu.memory_space<semaphore_mem>>) attributes {dimension_semantics = [], scalar_prefetch = 0 : i64, scratch_operands = 3 : i64, tpu.core_type = #tpu.core_type<tc>} {
    %c0_i32 = arith.constant 0 : i32
    %c0_i32_0 = arith.constant 0 : i32
    %c0_i32_1 = arith.constant 0 : i32
    %c0_i32_2 = arith.constant 0 : i32
    %c0_i32_3 = arith.constant 0 : i32
    %0 = tpu.memref_slice %arg1[%c0_i32, %c0_i32_2, %c0_i32_3] : memref<1x128x128xf32, #tpu.memory_space<any>> -> memref<1x128x128xf32, #tpu.memory_space<any>>
    %1 = tpu.memref_squeeze %0 : memref<1x128x128xf32, #tpu.memory_space<any>> -> memref<128x128xf32, #tpu.memory_space<any>>
    %c0_i32_4 = arith.constant 0 : i32
    %c0_i32_5 = arith.constant 0 : i32
    %2 = tpu.memref_slice %arg4[%c0_i32_0, %c0_i32_4, %c0_i32_5] : memref<1x128x128xf32, #tpu.memory_space<vmem>> -> memref<1x128x128xf32, #tpu.memory_space<vmem>>
    %3 = tpu.memref_squeeze %2 : memref<1x128x128xf32, #tpu.memory_space<vmem>> -> memref<128x128xf32, #tpu.memory_space<vmem>>
    %4 = tpu.memref_slice %arg6[%c0_i32_1] : memref<1x!tpu.dma_semaphore, #tpu.memory_space<semaphore_mem>> -> memref<1x!tpu.dma_semaphore, #tpu.memory_space<semaphore_mem>>
    %5 = tpu.memref_squeeze %4 : memref<1x!tpu.dma_semaphore, #tpu.memory_space<semaphore_mem>> -> memref<!tpu.dma_semaphore, #tpu.memory_space<semaphore_mem>>
    tpu.enqueue_dma source(%1 : memref<128x128xf32, #tpu.memory_space<any>>) target(%3 : memref<128x128xf32, #tpu.memory_space<vmem>>) target_semaphore(%5 : memref<!tpu.dma_semaphore, #tpu.memory_space<semaphore_mem>>)
    %c0 = arith.constant 0 : index
    %c0_6 = arith.constant 0 : index
    %6 = vector.load %arg0[%c0, %c0_6] : memref<32x128xf32, #tpu.memory_space<vmem>>, vector<32x128xf32>
    %c0_i32_7 = arith.constant 0 : i32
    %c0_i32_8 = arith.constant 0 : i32
    %c0_i32_9 = arith.constant 0 : i32
    %c0_i32_10 = arith.constant 0 : i32
    %c0_i32_11 = arith.constant 0 : i32
    %7 = tpu.memref_slice %arg1[%c0_i32_7, %c0_i32_10, %c0_i32_11] : memref<1x128x128xf32, #tpu.memory_space<any>> -> memref<1x128x128xf32, #tpu.memory_space<any>>
    %8 = tpu.memref_squeeze %7 : memref<1x128x128xf32, #tpu.memory_space<any>> -> memref<128x128xf32, #tpu.memory_space<any>>
    %c0_i32_12 = arith.constant 0 : i32
    %c0_i32_13 = arith.constant 0 : i32
    %9 = tpu.memref_slice %arg4[%c0_i32_8, %c0_i32_12, %c0_i32_13] : memref<1x128x128xf32, #tpu.memory_space<vmem>> -> memref<1x128x128xf32, #tpu.memory_space<vmem>>
    %10 = tpu.memref_squeeze %9 : memref<1x128x128xf32, #tpu.memory_space<vmem>> -> memref<128x128xf32, #tpu.memory_space<vmem>>
    %11 = tpu.memref_slice %arg6[%c0_i32_9] : memref<1x!tpu.dma_semaphore, #tpu.memory_space<semaphore_mem>> -> memref<1x!tpu.dma_semaphore, #tpu.memory_space<semaphore_mem>>
    %12 = tpu.memref_squeeze %11 : memref<1x!tpu.dma_semaphore, #tpu.memory_space<semaphore_mem>> -> memref<!tpu.dma_semaphore, #tpu.memory_space<semaphore_mem>>
    tpu.wait_dma2 semaphore(%12 : memref<!tpu.dma_semaphore, #tpu.memory_space<semaphore_mem>>) src(%8 : memref<128x128xf32, #tpu.memory_space<any>>) dst(%10 : memref<128x128xf32, #tpu.memory_space<vmem>>)
    %c0_14 = arith.constant 0 : index
    %c0_15 = arith.constant 0 : index
    %c0_16 = arith.constant 0 : index
    %13 = vector.load %arg4[%c0_14, %c0_15, %c0_16] : memref<1x128x128xf32, #tpu.memory_space<vmem>>, vector<1x128x128xf32>
    %14 = vector.shape_cast %13 : vector<1x128x128xf32> to vector<128x128xf32>
    %cst = arith.constant dense<0.000000e+00> : vector<32x128xf32>
    %15 = tpu.matmul %6, %14, %cst {dimension_numbers = #tpu.dot_dimension_numbers<[1], [0], [0], [1], [0, 0, 1, 1], [], []>} : vector<32x128xf32>, vector<128x128xf32>, vector<32x128xf32> -> vector<32x128xf32>
    %c0_17 = arith.constant 0 : index
    %c0_18 = arith.constant 0 : index
    %16 = vector.load %arg3[%c0_17, %c0_18] : memref<32x128xf32, #tpu.memory_space<vmem>>, vector<32x128xf32>
    tpu.vector_store %arg3[%c0_17, %c0_18], %15 {strides = array<i32>} : memref<32x128xf32, #tpu.memory_space<vmem>>, vector<32x128xf32>,
    %c0_19 = arith.constant 0 : index
    %c0_20 = arith.constant 0 : index
    %17 = vector.load %arg3[%c0_19, %c0_20] : memref<32x128xf32, #tpu.memory_space<vmem>>, vector<32x128xf32>
    %c0_21 = arith.constant 0 : index
    %c0_22 = arith.constant 0 : index
    %18 = vector.load %arg2[%c0_21, %c0_22] : memref<32x128xf32, #tpu.memory_space<vmem>>, vector<32x128xf32>
    tpu.vector_store %arg2[%c0_21, %c0_22], %17 {strides = array<i32>} : memref<32x128xf32, #tpu.memory_space<vmem>>, vector<32x128xf32>,
    %c0_23 = arith.constant 0 : index
    %c0_24 = arith.constant 0 : index
    %19 = vector.load %arg5[%c0_23, %c0_24] : memref<32x128xf32, #tpu.memory_space<vmem>>, vector<32x128xf32>
    tpu.vector_store %arg5[%c0_23, %c0_24], %17 {strides = array<i32>} : memref<32x128xf32, #tpu.memory_space<vmem>>, vector<32x128xf32>,
    %c0_25 = arith.constant 0 : index
    %c0_26 = arith.constant 0 : index
    %20 = vector.load %arg5[%c0_25, %c0_26] : memref<32x128xf32, #tpu.memory_space<vmem>>, vector<32x128xf32>
    %c0_27 = arith.constant 0 : index
    %c0_28 = arith.constant 0 : index
    %c0_29 = arith.constant 0 : index
    %21 = vector.load %arg4[%c0_27, %c0_28, %c0_29] : memref<1x128x128xf32, #tpu.memory_space<vmem>>, vector<1x128x128xf32>
    %22 = vector.shape_cast %21 : vector<1x128x128xf32> to vector<128x128xf32>
    %cst_30 = arith.constant dense<0.000000e+00> : vector<32x128xf32>
    %23 = tpu.matmul %20, %22, %cst_30 {dimension_numbers = #tpu.dot_dimension_numbers<[1], [0], [0], [1], [0, 0, 1, 1], [], []>} : vector<32x128xf32>, vector<128x128xf32>, vector<32x128xf32> -> vector<32x128xf32>
    %c0_31 = arith.constant 0 : index
    %c0_32 = arith.constant 0 : index
    %24 = vector.load %arg5[%c0_31, %c0_32] : memref<32x128xf32, #tpu.memory_space<vmem>>, vector<32x128xf32>
    tpu.vector_store %arg5[%c0_31, %c0_32], %23 {strides = array<i32>} : memref<32x128xf32, #tpu.memory_space<vmem>>, vector<32x128xf32>,
    %c0_33 = arith.constant 0 : index
    %c0_34 = arith.constant 0 : index
    %25 = vector.load %arg2[%c0_33, %c0_34] : memref<32x128xf32, #tpu.memory_space<vmem>>, vector<32x128xf32>
    %c0_35 = arith.constant 0 : index
    %c0_36 = arith.constant 0 : index
    %26 = vector.load %arg5[%c0_35, %c0_36] : memref<32x128xf32, #tpu.memory_space<vmem>>, vector<32x128xf32>
    %27 = arith.addf %25, %26 : vector<32x128xf32>
    %c0_37 = arith.constant 0 : index
    %c0_38 = arith.constant 0 : index
    %28 = vector.load %arg2[%c0_37, %c0_38] : memref<32x128xf32, #tpu.memory_space<vmem>>, vector<32x128xf32>
    tpu.vector_store %arg2[%c0_37, %c0_38], %27 {strides = array<i32>} : memref<32x128xf32, #tpu.memory_space<vmem>>, vector<32x128xf32>,
    %c0_39 = arith.constant 0 : index
    %c0_40 = arith.constant 0 : index
    %29 = vector.load %arg5[%c0_39, %c0_40] : memref<32x128xf32, #tpu.memory_space<vmem>>, vector<32x128xf32>
    %c0_41 = arith.constant 0 : index
    %c0_42 = arith.constant 0 : index
    %c0_43 = arith.constant 0 : index
    %30 = vector.load %arg4[%c0_41, %c0_42, %c0_43] : memref<1x128x128xf32, #tpu.memory_space<vmem>>, vector<1x128x128xf32>
    %31 = vector.shape_cast %30 : vector<1x128x128xf32> to vector<128x128xf32>
    %cst_44 = arith.constant dense<0.000000e+00> : vector<32x128xf32>
    %32 = tpu.matmul %29, %31, %cst_44 {dimension_numbers = #tpu.dot_dimension_numbers<[1], [0], [0], [1], [0, 0, 1, 1], [], []>} : vector<32x128xf32>, vector<128x128xf32>, vector<32x128xf32> -> vector<32x128xf32>
    %c0_45 = arith.constant 0 : index
    %c0_46 = arith.constant 0 : index
    %33 = vector.load %arg5[%c0_45, %c0_46] : memref<32x128xf32, #tpu.memory_space<vmem>>, vector<32x128xf32>
    tpu.vector_store %arg5[%c0_45, %c0_46], %32 {strides = array<i32>} : memref<32x128xf32, #tpu.memory_space<vmem>>, vector<32x128xf32>,
    %c0_47 = arith.constant 0 : index
    %c0_48 = arith.constant 0 : index
    %34 = vector.load %arg2[%c0_47, %c0_48] : memref<32x128xf32, #tpu.memory_space<vmem>>, vector<32x128xf32>
    %c0_49 = arith.constant 0 : index
    %c0_50 = arith.constant 0 : index
    %35 = vector.load %arg5[%c0_49, %c0_50] : memref<32x128xf32, #tpu.memory_space<vmem>>, vector<32x128xf32>
    %36 = arith.addf %34, %35 : vector<32x128xf32>
    %c0_51 = arith.constant 0 : index
    %c0_52 = arith.constant 0 : index
    %37 = vector.load %arg2[%c0_51, %c0_52] : memref<32x128xf32, #tpu.memory_space<vmem>>, vector<32x128xf32>
    tpu.vector_store %arg2[%c0_51, %c0_52], %36 {strides = array<i32>} : memref<32x128xf32, #tpu.memory_space<vmem>>, vector<32x128xf32>,
    %c0_53 = arith.constant 0 : index
    %c0_54 = arith.constant 0 : index
    %38 = vector.load %arg2[%c0_53, %c0_54] : memref<32x128xf32, #tpu.memory_space<vmem>>, vector<32x128xf32>
    %cst_55 = arith.constant 0.333333343 : f32
    %39 = vector.broadcast %cst_55 : f32 to vector<32x128xf32>
    %40 = arith.mulf %38, %39 : vector<32x128xf32>
    %c0_56 = arith.constant 0 : index
    %c0_57 = arith.constant 0 : index
    %41 = vector.load %arg2[%c0_56, %c0_57] : memref<32x128xf32, #tpu.memory_space<vmem>>, vector<32x128xf32>
    tpu.vector_store %arg2[%c0_56, %c0_57], %40 {strides = array<i32>} : memref<32x128xf32, #tpu.memory_space<vmem>>, vector<32x128xf32>,
    return
  }
}

</mosaic_0001>

<bundles_post_ra>
// kernel: tpu_custom_call.1
= control target key start
LH: loop header
LB: loop body
LE: loop exit
PB: predicated region body
PF: predicated region fallthrough
CT: control target
= control target key end

     0   :  { %9 = vsyncpa [#allocation6], 0  ;;  %s980_s0 = inlined_call_operand.hbm [shape: f32[32,128], index: 0, kind: input, shape index: {}]   ;;  %s981_s1 = inlined_call_operand.hbm [shape: f32[1,128,128], index: 1, kind: input, shape index: {}]   ;;  %s982_s2 = inlined_call_operand.hbm [shape: f32[32,128], index: 2, kind: output, shape index: {0}]   ;;  %s983_s3 = inlined_call_operand.hbm [shape: f32[32,128], index: 3, kind: output, shape index: {1}]  }
   0x1   :  { %10 = vsyncpa [#allocation7], 0 }
   0x2   :  { %11 = vsyncpa [#allocation10], 0  ;;  %s764_s12 = smov [#allocation5]  }
   0x3   :  { %s17_s13 = sshll.u32 %s764_s12, 4  ;;  %s18_s13 = int_to_ptr.vmem [resolvable:$true] %s17_s13 }
   0x4   :  { %s684_s14 = scalar_lea.vmem %s18_s13, 512  ;;  %p689_p1 = scmp.lt.s32.totalorder %s18_s13, %s18_s13 }
   0x5   :  { %p685_p0 = scmp.ne.s32.totalorder %s18_s13, %s684_s14  ;;  %p690_p2 = scmp.lt.s32.totalorder %s684_s14, %s684_s14 }
   0x7   :  { %p691_p3 = por %p690_p2, %p689_p1 }
   0x9   :  { %p692_p4 = pnand %p691_p3, %p685_p0 }
   0xb   :  { %695 = shalt.err (!%p692_p4)
}
   0xc   :  { %s765_s15 = smov 128   ;;  %s766_s16 = smov 8  }
   0xd   :  { %23 = dma.hbm_to_vmem [thread:$0]  %s980_s0, 512, %s18_s13, [#allocation6], %s765_s15, %s765_s15, %s766_s16  }
   0xe   :  { %756 = dma.done.wait [#allocation6], 512  }
   0xf   :  { %757 = vsyncadd [#allocation6], 4294966784  ;;  %s767_s19 = smov [#allocation2]  }
  0x10   :  { %s34_s20 = sshll.u32 %s767_s19, 4  ;;  %s35_s20 = int_to_ptr.vmem [resolvable:$true] %s34_s20 }
  0x11   :  { %s704_s21 = scalar_lea.vmem %s35_s20, 2048  ;;  %p709_p6 = scmp.lt.s32.totalorder %s35_s20, %s35_s20 }
  0x12   :  { %p705_p5 = scmp.ne.s32.totalorder %s35_s20, %s704_s21  ;;  %p710_p7 = scmp.lt.s32.totalorder %s704_s21, %s704_s21 }
  0x14   :  { %p711_p8 = por %p710_p7, %p709_p6 }
  0x16   :  { %p712_p9 = pnand %p711_p8, %p705_p5 }
  0x18   :  { %715 = shalt.err (!%p712_p9)  }
  0x19   :  { %37 = dma.hbm_to_vmem [thread:$0]  %s981_s1, 2048, %s35_s20, [#allocation4]  ;;  %v38_v0 = vld [vmem:[#allocation5] sm:$0xff]  ;;  %v799_v1 = vld [vmem:[#allocation5 + $0x8] sm:$0xff]  ;;  %v801_v2 = vld [vmem:[#allocation5 + $0x10] sm:$0xff] }
  0x1a   :  { %v803_v3 = vld [vmem:[#allocation5 + $0x18] sm:$0xff] }
  0x1b   :  { %758 = dma.done.wait [#allocation4], 2048 }
  0x1c   :  { %759 = vsyncadd [#allocation4], 4294965248  ;;  %556 = vmatprep.mubr.f32.mxu0 %v38_v0  ;;  %v805_v4 = vld [vmem:[#allocation2 + $0x78] sm:$0xff]  ;;  %v807_v5 = vld [vmem:[#allocation2 + $0x70] sm:$0xff]  ;;  %s768_s0 = smov [#allocation9]  }
  0x1d   :  { %524 = vmatprep.subr.mxu0 %v805_v4  ;;  %562 = vmatprep.subr.mxu1 %v805_v4  ;;  %v812_v6 = vld [vmem:[#allocation2 + $0x68] sm:$0xff]  ;;  %v818_v7 = vld [vmem:[#allocation2 + $0x60] sm:$0xff]  ;;  %v824_v8 = vld [vmem:[#allocation2 + $0x58] sm:$0xff]  ;;  %s441_s1 = sshll.u32 %s768_s0, 4  ;;  %s442_s1 = int_to_ptr.vmem [resolvable:$true] %s441_s1 }
  0x1e   :  { %525 = vmatpush3.msra.mxu0 %v805_v4  ;;  %563 = vmatpush3.msra.mxu1 %v805_v4  ;;  %v830_v9 = vld [vmem:[#allocation2 + $0x50] sm:$0xff]  ;;  %v836_v10 = vld [vmem:[#allocation2 + $0x48] sm:$0xff]  ;;  %v842_v11 = vld [vmem:[#allocation2 + $0x40] sm:$0xff]  ;;  %s716_s24 = scalar_lea.vmem %s442_s1, 512  ;;  %p721_p11 = scmp.lt.s32.totalorder %s442_s1, %s442_s1 }
  0x1f   :  { %526 = vmatprep.subr.mxu0 %v807_v5  ;;  %564 = vmatprep.subr.mxu1 %v807_v5  ;;  %v848_v12 = vld [vmem:[#allocation2 + $0x38] sm:$0xff]  ;;  %v854_v13 = vld [vmem:[#allocation2 + $0x30] sm:$0xff]  ;;  %v860_v14 = vld [vmem:[#allocation2 + $0x28] sm:$0xff]  ;;  %p717_p10 = scmp.ne.s32.totalorder %s442_s1, %s716_s24  ;;  %p722_p12 = scmp.lt.s32.totalorder %s716_s24, %s716_s24 }
  0x20   :  { %527 = vmatpush3.msra.mxu0 %v807_v5  ;;  %565 = vmatpush3.msra.mxu1 %v807_v5  ;;  %v866_v15 = vld [vmem:[#allocation2 + $0x20] sm:$0xff]  ;;  %v872_v16 = vld [vmem:[#allocation2 + $0x18] sm:$0xff]  ;;  %v878_v17 = vld [vmem:[#allocation2 + $0x10] sm:$0xff] }
  0x21   :  { %528 = vmatprep.subr.mxu0 %v812_v6  ;;  %566 = vmatprep.subr.mxu1 %v812_v6  ;;  %v884_v18 = vld [vmem:[#allocation2 + $0x8] sm:$0xff]  ;;  %v890_v19 = vld [vmem:[#allocation2] sm:$0xff]  ;;  %p723_p13 = por %p722_p12, %p721_p11 }
  0x22   :  { %529 = vmatpush3.msra.mxu0 %v812_v6  ;;  %567 = vmatpush3.msra.mxu1 %v812_v6 }
  0x23   :  { %530 = vmatprep.subr.mxu0 %v818_v7  ;;  %568 = vmatprep.subr.mxu1 %v818_v7  ;;  %p724_p0 = pnand %p723_p13, %p717_p10 }
  0x24   :  { %531 = vmatpush3.msra.mxu0 %v818_v7  ;;  %569 = vmatpush3.msra.mxu1 %v818_v7 }
  0x25   :  { %532 = vmatprep.subr.mxu0 %v824_v8  ;;  %570 = vmatprep.subr.mxu1 %v824_v8 }
  0x26   :  { %533 = vmatpush3.msra.mxu0 %v824_v8  ;;  %571 = vmatpush3.msra.mxu1 %v824_v8 }
  0x27   :  { %534 = vmatprep.subr.mxu0 %v830_v9  ;;  %572 = vmatprep.subr.mxu1 %v830_v9 }
  0x28   :  { %535 = vmatpush3.msra.mxu0 %v830_v9  ;;  %573 = vmatpush3.msra.mxu1 %v830_v9 }
  0x29   :  { %536 = vmatprep.subr.mxu0 %v836_v10  ;;  %574 = vmatprep.subr.mxu1 %v836_v10 }
  0x2a   :  { %537 = vmatpush3.msra.mxu0 %v836_v10  ;;  %575 = vmatpush3.msra.mxu1 %v836_v10 }
  0x2b   :  { %538 = vmatprep.subr.mxu0 %v842_v11  ;;  %576 = vmatprep.subr.mxu1 %v842_v11 }
  0x2c   :  { %539 = vmatpush3.msra.mxu0 %v842_v11  ;;  %577 = vmatpush3.msra.mxu1 %v842_v11 }
  0x2d   :  { %540 = vmatprep.subr.mxu0 %v848_v12  ;;  %578 = vmatprep.subr.mxu1 %v848_v12 }
  0x2e   :  { %541 = vmatpush3.msra.mxu0 %v848_v12  ;;  %579 = vmatpush3.msra.mxu1 %v848_v12 }
  0x2f   :  { %542 = vmatprep.subr.mxu0 %v854_v13  ;;  %580 = vmatprep.subr.mxu1 %v854_v13 }
  0x30   :  { %543 = vmatpush3.msra.mxu0 %v854_v13  ;;  %581 = vmatpush3.msra.mxu1 %v854_v13 }
  0x31   :  { %544 = vmatprep.subr.mxu0 %v860_v14  ;;  %582 = vmatprep.subr.mxu1 %v860_v14 }
  0x32   :  { %545 = vmatpush3.msra.mxu0 %v860_v14  ;;  %583 = vmatpush3.msra.mxu1 %v860_v14 }
  0x33   :  { %546 = vmatprep.subr.mxu0 %v866_v15  ;;  %584 = vmatprep.subr.mxu1 %v866_v15 }
  0x34   :  { %547 = vmatpush3.msra.mxu0 %v866_v15  ;;  %585 = vmatpush3.msra.mxu1 %v866_v15 }
  0x35   :  { %548 = vmatprep.subr.mxu0 %v872_v16  ;;  %586 = vmatprep.subr.mxu1 %v872_v16 }
  0x36   :  { %549 = vmatpush3.msra.mxu0 %v872_v16  ;;  %587 = vmatpush3.msra.mxu1 %v872_v16 }
  0x37   :  { %550 = vmatprep.subr.mxu0 %v878_v17  ;;  %588 = vmatprep.subr.mxu1 %v878_v17 }
  0x38   :  { %551 = vmatpush3.msra.mxu0 %v878_v17  ;;  %589 = vmatpush3.msra.mxu1 %v878_v17 }
  0x39   :  { %552 = vmatprep.subr.mxu0 %v884_v18  ;;  %590 = vmatprep.subr.mxu1 %v884_v18 }
  0x3a   :  { %553 = vmatpush3.msra.mxu0 %v884_v18  ;;  %591 = vmatpush3.msra.mxu1 %v884_v18 }
  0x3b   :  { %554 = vmatprep.subr.mxu0 %v890_v19  ;;  %592 = vmatprep.subr.mxu1 %v890_v19 }
  0x3c   :  { %555 = vmatpush3.msra.mxu0 %v890_v19  ;;  %593 = vmatpush3.msra.mxu1 %v890_v19 }
  0x3d   :  { %557 = vmatmul.mubr.f32.vlgmr.msra.gmra.mxu0 %v799_v1  ;;  %600 = vmatprep.subr.mxu0 %v805_v4 }
  0x3e   :  { %559 = vmatprep.mubr.f32.mxu0 %v801_v2  ;;  %601 = vmatpush3.msra.mxu0 %v805_v4 }
  0x3f   :  { %602 = vmatprep.subr.mxu0 %v807_v5  ;;  %638 = vmatprep.subr.mxu1 %v805_v4 }
  0x40   :  { %603 = vmatpush3.msra.mxu0 %v807_v5 }
  0x41   :  { %560 = vmatmul.mubr.f32.gmra.mxu0 %v803_v3  ;;  %604 = vmatprep.subr.mxu0 %v812_v6 }
  0x42   :  { %605 = vmatpush3.msra.mxu0 %v812_v6 }
  0x43   :  { %606 = vmatprep.subr.mxu0 %v818_v7 }
  0x44   :  { %607 = vmatpush3.msra.mxu0 %v818_v7 }
  0x45   :  { %608 = vmatprep.subr.mxu0 %v824_v8 }
  0x46   :  { %609 = vmatpush3.msra.mxu0 %v824_v8 }
  0x47   :  { %610 = vmatprep.subr.mxu0 %v830_v9 }
  0x48   :  { %611 = vmatpush3.msra.mxu0 %v830_v9 }
  0x49   :  { %612 = vmatprep.subr.mxu0 %v836_v10 }
  0x4a   :  { %613 = vmatpush3.msra.mxu0 %v836_v10 }
  0x4b   :  { %614 = vmatprep.subr.mxu0 %v842_v11 }
  0x4c   :  { %615 = vmatpush3.msra.mxu0 %v842_v11 }
  0x4d   :  { %616 = vmatprep.subr.mxu0 %v848_v12 }
  0x4e   :  { %617 = vmatpush3.msra.mxu0 %v848_v12 }
  0x4f   :  { %618 = vmatprep.subr.mxu0 %v854_v13 }
  0x50   :  { %619 = vmatpush3.msra.mxu0 %v854_v13 }
  0x51   :  { %620 = vmatprep.subr.mxu0 %v860_v14 }
  0x52   :  { %621 = vmatpush3.msra.mxu0 %v860_v14 }
  0x53   :  { %622 = vmatprep.subr.mxu0 %v866_v15 }
  0x54   :  { %623 = vmatpush3.msra.mxu0 %v866_v15 }
  0x55   :  { %624 = vmatprep.subr.mxu0 %v872_v16 }
  0x56   :  { %625 = vmatpush3.msra.mxu0 %v872_v16 }
  0x57   :  { %626 = vmatprep.subr.mxu0 %v878_v17 }
  0x58   :  { %627 = vmatpush3.msra.mxu0 %v878_v17 }
  0x59   :  { %628 = vmatprep.subr.mxu0 %v884_v18 }
  0x5a   :  { %629 = vmatpush3.msra.mxu0 %v884_v18 }
  0x5b   :  { %630 = vmatprep.subr.mxu0 %v890_v19 }
  0x5c   :  { %631 = vmatpush3.msra.mxu0 %v890_v19 }
  0xfd   :  { %v558_v20 = vpop.f32.mrf.mxu0 }
  0xfe   :  { %147 = vst [vmem:[#allocation9 + $0x8] sm:$0xff] %v558_v20 }
  0xff   :  { %v127_v21 = vpop.f32.mrf.mxu0 }
 0x100   :  { %146 = vst [vmem:[#allocation9] sm:$0xff] %v127_v21  ;;  %594 = vmatprep.mubr.f32.mxu1 %v127_v21 }
 0x101   :  { %v561_v22 = vpop.f32.mrf.mxu0  ;;  %595 = vmatmul.mubr.f32.vlgmr.msra.gmra.mxu1 %v558_v20 }
 0x102   :  { %149 = vst [vmem:[#allocation9 + $0x18] sm:$0xff] %v561_v22  ;;  %654 = vmatpush3.msra.mxu1 %v805_v4 }
 0x103   :  { %v137_v23 = vpop.f32.mrf.mxu0  ;;  %639 = vmatprep.subr.mxu1 %v807_v5 }
 0x104   :  { %148 = vst [vmem:[#allocation9 + $0x10] sm:$0xff] %v137_v23  ;;  %597 = vmatprep.mubr.f32.mxu1 %v137_v23  ;;  %655 = vmatpush3.msra.mxu1 %v807_v5 }
 0x105   :  { %598 = vmatmul.mubr.f32.gmra.mxu1 %v561_v22  ;;  %640 = vmatprep.subr.mxu1 %v812_v6 }
 0x106   :  { %656 = vmatpush3.msra.mxu1 %v812_v6 }
 0x107   :  { %641 = vmatprep.subr.mxu1 %v818_v7 }
 0x108   :  { %657 = vmatpush3.msra.mxu1 %v818_v7 }
 0x109   :  { %642 = vmatprep.subr.mxu1 %v824_v8 }
 0x10a   :  { %658 = vmatpush3.msra.mxu1 %v824_v8 }
 0x10b   :  { %643 = vmatprep.subr.mxu1 %v830_v9 }
 0x10c   :  { %659 = vmatpush3.msra.mxu1 %v830_v9 }
 0x10d   :  { %644 = vmatprep.subr.mxu1 %v836_v10 }
 0x10e   :  { %660 = vmatpush3.msra.mxu1 %v836_v10 }
 0x10f   :  { %645 = vmatprep.subr.mxu1 %v842_v11 }
 0x110   :  { %661 = vmatpush3.msra.mxu1 %v842_v11 }
 0x111   :  { %646 = vmatprep.subr.mxu1 %v848_v12 }
 0x112   :  { %662 = vmatpush3.msra.mxu1 %v848_v12 }
 0x113   :  { %647 = vmatprep.subr.mxu1 %v854_v13 }
 0x114   :  { %663 = vmatpush3.msra.mxu1 %v854_v13 }
 0x115   :  { %648 = vmatprep.subr.mxu1 %v860_v14 }
 0x116   :  { %664 = vmatpush3.msra.mxu1 %v860_v14 }
 0x117   :  { %649 = vmatprep.subr.mxu1 %v866_v15 }
 0x118   :  { %665 = vmatpush3.msra.mxu1 %v866_v15 }
 0x119   :  { %650 = vmatprep.subr.mxu1 %v872_v16 }
 0x11a   :  { %666 = vmatpush3.msra.mxu1 %v872_v16 }
 0x11b   :  { %651 = vmatprep.subr.mxu1 %v878_v17 }
 0x11c   :  { %667 = vmatpush3.msra.mxu1 %v878_v17 }
 0x11d   :  { %652 = vmatprep.subr.mxu1 %v884_v18 }
 0x11e   :  { %668 = vmatpush3.msra.mxu1 %v884_v18 }
 0x11f   :  { %653 = vmatprep.subr.mxu1 %v890_v19 }
 0x120   :  { %669 = vmatpush3.msra.mxu1 %v890_v19 }
 0x1c1   :  { %v596_v24 = vpop.f32.mrf.mxu1 }
 0x1c3   :  { %v248_v25 = vpop.f32.mrf.mxu1 }
 0x1c4   :  { %632 = vmatprep.mubr.f32.mxu0 %v248_v25 }
 0x1c5   :  { %v599_v26 = vpop.f32.mrf.mxu1  ;;  %633 = vmatmul.mubr.f32.vlgmr.msra.gmra.mxu0 %v596_v24 }
 0x1c7   :  { %v258_v27 = vpop.f32.mrf.mxu1 }
 0x1c8   :  { %635 = vmatprep.mubr.f32.mxu1 %v258_v27 }
 0x1c9   :  { %636 = vmatmul.mubr.f32.vlgmr.msra.gmra.mxu1 %v599_v26 }
 0x1ca   :  { %727 = shalt.err (!%p724_p0)
}
 0x1cb   :  { %447 = dma.vmem_to_hbm [thread:$0]  %s442_s1, 512, %s983_s3, [#allocation10], %s765_s15, %s765_s15, %s766_s16   ;;  %v280_v28 = vadd.f32 %v596_v24, %v558_v20  ;;  %v279_v30 = vadd.f32 %v248_v25, %v127_v21  ;;  %v282_v33 = vadd.f32 %v599_v26, %v561_v22  ;;  %v281_v37 = vadd.f32 %v258_v27, %v137_v23 }
 0x1cc   :  { %s769_s27 = smov [#allocation8]  }
 0x1cd   :  { %s429_s28 = sshll.u32 %s769_s27, 4  ;;  %s430_s28 = int_to_ptr.vmem [resolvable:$true] %s429_s28 }
 0x1ce   :  { %s736_s3 = scalar_lea.vmem %s430_s28, 512  ;;  %p741_p2 = scmp.lt.s32.totalorder %s430_s28, %s430_s28 }
 0x1cf   :  { %p737_p1 = scmp.ne.s32.totalorder %s430_s28, %s736_s3  ;;  %p742_p3 = scmp.lt.s32.totalorder %s736_s3, %s736_s3 }
 0x1d1   :  { %p743_p4 = por %p742_p3, %p741_p2 }
 0x1d3   :  { %p744_p5 = pnand %p743_p4, %p737_p1 }
 0x285   :  { %v634_v29 = vpop.f32.mrf.mxu0 }
 0x286   :  { %v405_v31 = vadd.f32 %v634_v29, %v280_v28 }
 0x287   :  { %v373_v32 = vpop.f32.mrf.mxu0 }
 0x288   :  { %v404_v34 = vadd.f32 %v373_v32, %v279_v30  ;;  %v417_v35 = vmul.f32 0.33333334, %v405_v31 }
 0x289   :  { %v637_v36 = vpop.f32.mrf.mxu1 }
 0x28a   :  { %v407_v38 = vadd.f32 %v637_v36, %v282_v33  ;;  %v416_v39 = vmul.f32 0.33333334, %v404_v34  ;;  %421 = vst [vmem:[#allocation8 + $0x8] sm:$0xff] %v417_v35 }
 0x28b   :  { %v383_v40 = vpop.f32.mrf.mxu1 }
 0x28c   :  { %v406_v41 = vadd.f32 %v383_v40, %v281_v37  ;;  %v419_v42 = vmul.f32 0.33333334, %v407_v38  ;;  %420 = vst [vmem:[#allocation8] sm:$0xff] %v416_v39 }
 0x28e   :  { %v418_v43 = vmul.f32 0.33333334, %v406_v41  ;;  %423 = vst [vmem:[#allocation8 + $0x18] sm:$0xff] %v419_v42 }
 0x290   :  { %422 = vst [vmem:[#allocation8 + $0x10] sm:$0xff] %v418_v43 }
 0x291   :  { %747 = shalt.err (!%p744_p5)
}
 0x292   :  { %435 = dma.vmem_to_hbm [thread:$0]  %s430_s28, 512, %s982_s2, [#allocation7], %s765_s15, %s765_s15, %s766_s16  }
 0x293   :  { %760 = dma.done.wait [#allocation7], 512  }
 0x294   :  { %761 = vsyncadd [#allocation7], 4294966784 }
 0x295   :  { %762 = dma.done.wait [#allocation10], 512  }
 0x296   :  { %763 = vsyncadd [#allocation10], 4294966784 }
 0x297   :  { %454 = vsyncpa [#allocation6], 1 }
 0x298   :  { %455 = vsyncpa [#allocation7], 1 }
 0x299   :  { %456 = vsyncpa [#allocation10], 1 }
 0x29a   :  { %457 = vsyncmov [#allocation4] }
 0x29d   :  { %s458_s4 = vpop.sfrf %457 }
 0x29e   :  { %p463_p6 = scmp.ne.s32.totalorder %s458_s4, 0 }
 0x2a0   :  { %462 = shalt.err (%p463_p6)  }

</bundles_post_ra>
